<compile_context>
chip_gen: v7x
topology: tpu7x:2x2x1
jax: 0.10.0
libtpu: 0.0.40
codegen_flags: <defaults>
</compile_context>

<pallas_src>
import jax
import jax.numpy as jnp
import numpy as np
from jax.experimental import pallas as pl
from jax.experimental.pallas import tpu as pltpu


def _context_momentum_kernel(scal_ref, J_ref, mom_ref, met_ref, p_out_ref, M_out_ref):
    # Static shapes: J (L,B,m,d), mom (L,B,m,1), met (L,B,m,m), scal (L,1,1,1).
    L, B, m, d = J_ref.shape

    J = J_ref[...]                      # (L,B,m,d)
    sJ = J * scal_ref[...]              # fold per-leaf scaling into one small multiply
    mom = mom_ref[...]                  # (L,B,m,1)
    met = met_ref[...]                  # (L,B,m,m)

    # momentum_root[b,i] = sum_{l,j} s[l] * J[l,b,j,i] * mom[l,b,j]
    pj = sJ * mom                                        # lane-broadcast of mom
    p = jnp.sum(jnp.sum(pj, axis=0), axis=1)             # (B,d)
    p_out_ref[...] = p

    # MJ[l,b,j,e] = sum_k met[l,b,j,k] * J[l,b,k,e]
    # Pure-VPU outer-product accumulation (m is small & static -> unrolled);
    # avoids MXU push/pop latency for sub-vreg matmuls.
    MJ = jnp.zeros_like(J)
    for k in range(m):
        MJ = MJ + met[:, :, :, k:k + 1] * J[:, :, k:k + 1, :]

    # metric_root[b,i,e] = sum_{l,j} s[l] * J[l,b,j,i] * MJ[l,b,j,e]
    # Emit one row i at a time with first-axis stores into a (d,B,d) output.
    for i in range(d):
        row = sJ[:, :, :, i:i + 1] * MJ                  # (L,B,m,d)
        M_out_ref[i] = jnp.sum(jnp.sum(row, axis=0), axis=1)   # (B,d)


@jax.jit
def context_momentum_pallas(scaling, J_stack, mom_stack, met_stack):
    L, B, m, d = J_stack.shape
    scal4 = scaling.reshape(L, 1, 1, 1)      # broadcastable against (L,B,m,d)
    mom4 = mom_stack[..., None]              # (L,B,m,1): m on sublanes, matches J layout

    p, M_rows = pl.pallas_call(
        _context_momentum_kernel,
        in_specs=[pl.BlockSpec(memory_space=pltpu.MemorySpace.VMEM)] * 4,
        out_specs=(pl.BlockSpec(memory_space=pltpu.MemorySpace.VMEM),
                   pl.BlockSpec(memory_space=pltpu.MemorySpace.VMEM)),
        out_shape=(
            jax.ShapeDtypeStruct((B, d), jnp.float32),
            jax.ShapeDtypeStruct((d, B, d), jnp.float32),
        ),
    )(scal4, J_stack, mom4, met_stack)

    metric_root = jnp.transpose(M_rows, (1, 0, 2))       # (d,B,d) -> (B,d,d)
    return p, metric_root


class ContextMomentumNet:
    """JAX/Pallas port of differentiable_rmpflow ContextMomentumNet.forward."""

    def __init__(self, lagrangian_vel_nets, n_dims, metric_scaling=None, name=None):
        self.lagrangian_vel_nets = list(lagrangian_vel_nets)
        self.n_dims = n_dims
        self.name = name
        if metric_scaling is None:
            self.metric_scaling = [1.0 for _ in self.lagrangian_vel_nets]
        else:
            self.metric_scaling = metric_scaling
        assert len(self.metric_scaling) == len(self.lagrangian_vel_nets)

    def __call__(self, state, q_leaf_list, J_list, momentum_list, metric_list):
        assert state.ndim in (1, 2, 3)
        if state.ndim == 1:
            state = state[None, :]
        elif state.ndim == 3:
            assert state.shape[2] == 1
            state = state[:, :, 0]
        assert state.ndim == 2 and state.shape[1] == self.n_dims
        n_samples = state.shape[0]

        # TODO(synk): non-None lagrangian_vel_nets (per-leaf sub-modules whose
        # architecture the reference module does not define) are not implemented;
        # all nets are None here, so the supplied momentum/metric are used directly.
        for net in self.lagrangian_vel_nets:
            assert net is None

        d = self.n_dims
        # Zero-pad ragged leaves to a common m (padded rows/cols contribute nothing
        # to J^T p or J^T M J). For static leaf shapes this pad/stack should be
        # hoisted out of the hot path (it is wrapper-side XLA work, not kernel work).
        m_max = max(J.shape[1] for J in J_list)
        Js, moms, mets = [], [], []
        for J, mom, met in zip(J_list, momentum_list, metric_list):
            pad = m_max - J.shape[1]
            Js.append(jnp.pad(J.astype(jnp.float32), ((0, 0), (0, pad), (0, 0))))
            moms.append(jnp.pad(mom.astype(jnp.float32), ((0, 0), (0, pad))))
            mets.append(jnp.pad(met.astype(jnp.float32), ((0, 0), (0, pad), (0, pad))))

        J_stack = jnp.stack(Js)       # (L, B, m_max, d)
        mom_stack = jnp.stack(moms)   # (L, B, m_max)
        met_stack = jnp.stack(mets)   # (L, B, m_max, m_max)
        scaling = jnp.asarray(self.metric_scaling, dtype=jnp.float32)

        assert J_stack.shape[1] == n_samples and J_stack.shape[3] == d
        return context_momentum_pallas(scaling, J_stack, mom_stack, met_stack)


if __name__ == "__main__":
    key = jax.random.PRNGKey(0)
    B, d = 2, 4
    leaf_dims = [8, 5, 8]
    L = len(leaf_dims)

    keys = jax.random.split(key, 1 + 4 * L)
    state = jax.random.normal(keys[0], (B, d), dtype=jnp.float32)

    q_leaf_list, J_list, momentum_list, metric_list = [], [], [], []
    ki = 1
    for m in leaf_dims:
        q_leaf_list.append(jax.random.normal(keys[ki], (B, m), dtype=jnp.float32)); ki += 1
        J_list.append(jax.random.normal(keys[ki], (B, m, d), dtype=jnp.float32)); ki += 1
        momentum_list.append(jax.random.normal(keys[ki], (B, m), dtype=jnp.float32)); ki += 1
        A = jax.random.normal(keys[ki], (B, m, m), dtype=jnp.float32); ki += 1
        metric_list.append(jnp.einsum('bij,bkj->bik', A, A) + 1e-2 * jnp.eye(m, dtype=jnp.float32))

    scaling = [1.0, 0.5, 2.0]
    net = ContextMomentumNet([None] * L, n_dims=d, metric_scaling=scaling)

    momentum_root, metric_root = net(state, q_leaf_list, J_list, momentum_list, metric_list)
    jax.block_until_ready((momentum_root, metric_root))

    # Pure-JAX reference (silent on success).
    p_ref = jnp.zeros((B, d), jnp.float32)
    M_ref = jnp.zeros((B, d, d), jnp.float32)
    for s_, J, mom, met in zip(scaling, J_list, momentum_list, metric_list):
        p_ref = p_ref + s_ * jnp.einsum('bji,bj->bi', J, mom)
        M_ref = M_ref + s_ * jnp.einsum('bji,bjk,bkl->bil', J, met, J)

    assert np.allclose(np.asarray(momentum_root), np.asarray(p_ref), atol=1e-4, rtol=1e-4)
    assert np.allclose(np.asarray(metric_root), np.asarray(M_ref), atol=1e-4, rtol=1e-4)
    print("KERNEL_OK")
</pallas_src>

<mosaic_0001>
module attributes {stable_mosaic.version = 11 : i64} {
  func.func @_context_momentum_kernel(%arg0: memref<3x1x1x1xf32, #tpu.memory_space<vmem>>, %arg1: memref<3x2x8x4xf32, #tpu.memory_space<vmem>>, %arg2: memref<3x2x8x1xf32, #tpu.memory_space<vmem>>, %arg3: memref<3x2x8x8xf32, #tpu.memory_space<vmem>>, %arg4: memref<2x4xf32, #tpu.memory_space<vmem>>, %arg5: memref<4x2x4xf32, #tpu.memory_space<vmem>>) attributes {dimension_semantics = [], scalar_prefetch = 0 : i64, scratch_operands = 0 : i64, tpu.core_type = #tpu.core_type<tc>} {
    %c0 = arith.constant 0 : index
    %c0_0 = arith.constant 0 : index
    %c0_1 = arith.constant 0 : index
    %c0_2 = arith.constant 0 : index
    %0 = vector.load %arg1[%c0, %c0_0, %c0_1, %c0_2] : memref<3x2x8x4xf32, #tpu.memory_space<vmem>>, vector<3x2x8x4xf32>
    %c0_3 = arith.constant 0 : index
    %c0_4 = arith.constant 0 : index
    %c0_5 = arith.constant 0 : index
    %c0_6 = arith.constant 0 : index
    %1 = vector.load %arg0[%c0_3, %c0_4, %c0_5, %c0_6] : memref<3x1x1x1xf32, #tpu.memory_space<vmem>>, vector<3x1x1x1xf32>
    %2 = vector.broadcast %1 : vector<3x1x1x1xf32> to vector<3x2x8x4xf32>
    %3 = arith.mulf %0, %2 : vector<3x2x8x4xf32>
    %c0_7 = arith.constant 0 : index
    %c0_8 = arith.constant 0 : index
    %c0_9 = arith.constant 0 : index
    %c0_10 = arith.constant 0 : index
    %4 = vector.load %arg2[%c0_7, %c0_8, %c0_9, %c0_10] : memref<3x2x8x1xf32, #tpu.memory_space<vmem>>, vector<3x2x8x1xf32>
    %c0_11 = arith.constant 0 : index
    %c0_12 = arith.constant 0 : index
    %c0_13 = arith.constant 0 : index
    %c0_14 = arith.constant 0 : index
    %5 = vector.load %arg3[%c0_11, %c0_12, %c0_13, %c0_14] : memref<3x2x8x8xf32, #tpu.memory_space<vmem>>, vector<3x2x8x8xf32>
    %6 = vector.broadcast %4 : vector<3x2x8x1xf32> to vector<3x2x8x4xf32>
    %7 = arith.mulf %3, %6 : vector<3x2x8x4xf32>
    %cst = arith.constant dense<0.000000e+00> : vector<2x8x4xf32>
    %8 = vector.multi_reduction <add>, %7, %cst [0] : vector<3x2x8x4xf32> to vector<2x8x4xf32>
    %cst_15 = arith.constant dense<0.000000e+00> : vector<2x4xf32>
    %9 = vector.multi_reduction <add>, %8, %cst_15 [1] : vector<2x8x4xf32> to vector<2x4xf32>
    %c0_16 = arith.constant 0 : index
    %c0_17 = arith.constant 0 : index
    %10 = vector.load %arg4[%c0_16, %c0_17] : memref<2x4xf32, #tpu.memory_space<vmem>>, vector<2x4xf32>
    tpu.vector_store %arg4[%c0_16, %c0_17], %9 {strides = array<i32>} : memref<2x4xf32, #tpu.memory_space<vmem>>, vector<2x4xf32>,
    %cst_18 = arith.constant 0.000000e+00 : f32
    %11 = vector.broadcast %cst_18 : f32 to vector<3x2x8x4xf32>
    %12 = vector.extract_strided_slice %5 {offsets = [0, 0, 0, 0], sizes = [3, 2, 8, 1], strides = [1, 1, 1, 1]} : vector<3x2x8x8xf32> to vector<3x2x8x1xf32>
    %13 = vector.extract_strided_slice %0 {offsets = [0, 0, 0, 0], sizes = [3, 2, 1, 4], strides = [1, 1, 1, 1]} : vector<3x2x8x4xf32> to vector<3x2x1x4xf32>
    %14 = vector.broadcast %12 : vector<3x2x8x1xf32> to vector<3x2x8x4xf32>
    %15 = vector.broadcast %13 : vector<3x2x1x4xf32> to vector<3x2x8x4xf32>
    %16 = arith.mulf %14, %15 : vector<3x2x8x4xf32>
    %17 = arith.addf %11, %16 : vector<3x2x8x4xf32>
    %18 = vector.extract_strided_slice %5 {offsets = [0, 0, 0, 1], sizes = [3, 2, 8, 1], strides = [1, 1, 1, 1]} : vector<3x2x8x8xf32> to vector<3x2x8x1xf32>
    %19 = vector.extract_strided_slice %0 {offsets = [0, 0, 1, 0], sizes = [3, 2, 1, 4], strides = [1, 1, 1, 1]} : vector<3x2x8x4xf32> to vector<3x2x1x4xf32>
    %20 = vector.broadcast %18 : vector<3x2x8x1xf32> to vector<3x2x8x4xf32>
    %21 = vector.broadcast %19 : vector<3x2x1x4xf32> to vector<3x2x8x4xf32>
    %22 = arith.mulf %20, %21 : vector<3x2x8x4xf32>
    %23 = arith.addf %17, %22 : vector<3x2x8x4xf32>
    %24 = vector.extract_strided_slice %5 {offsets = [0, 0, 0, 2], sizes = [3, 2, 8, 1], strides = [1, 1, 1, 1]} : vector<3x2x8x8xf32> to vector<3x2x8x1xf32>
    %25 = vector.extract_strided_slice %0 {offsets = [0, 0, 2, 0], sizes = [3, 2, 1, 4], strides = [1, 1, 1, 1]} : vector<3x2x8x4xf32> to vector<3x2x1x4xf32>
    %26 = vector.broadcast %24 : vector<3x2x8x1xf32> to vector<3x2x8x4xf32>
    %27 = vector.broadcast %25 : vector<3x2x1x4xf32> to vector<3x2x8x4xf32>
    %28 = arith.mulf %26, %27 : vector<3x2x8x4xf32>
    %29 = arith.addf %23, %28 : vector<3x2x8x4xf32>
    %30 = vector.extract_strided_slice %5 {offsets = [0, 0, 0, 3], sizes = [3, 2, 8, 1], strides = [1, 1, 1, 1]} : vector<3x2x8x8xf32> to vector<3x2x8x1xf32>
    %31 = vector.extract_strided_slice %0 {offsets = [0, 0, 3, 0], sizes = [3, 2, 1, 4], strides = [1, 1, 1, 1]} : vector<3x2x8x4xf32> to vector<3x2x1x4xf32>
    %32 = vector.broadcast %30 : vector<3x2x8x1xf32> to vector<3x2x8x4xf32>
    %33 = vector.broadcast %31 : vector<3x2x1x4xf32> to vector<3x2x8x4xf32>
    %34 = arith.mulf %32, %33 : vector<3x2x8x4xf32>
    %35 = arith.addf %29, %34 : vector<3x2x8x4xf32>
    %36 = vector.extract_strided_slice %5 {offsets = [0, 0, 0, 4], sizes = [3, 2, 8, 1], strides = [1, 1, 1, 1]} : vector<3x2x8x8xf32> to vector<3x2x8x1xf32>
    %37 = vector.extract_strided_slice %0 {offsets = [0, 0, 4, 0], sizes = [3, 2, 1, 4], strides = [1, 1, 1, 1]} : vector<3x2x8x4xf32> to vector<3x2x1x4xf32>
    %38 = vector.broadcast %36 : vector<3x2x8x1xf32> to vector<3x2x8x4xf32>
    %39 = vector.broadcast %37 : vector<3x2x1x4xf32> to vector<3x2x8x4xf32>
    %40 = arith.mulf %38, %39 : vector<3x2x8x4xf32>
    %41 = arith.addf %35, %40 : vector<3x2x8x4xf32>
    %42 = vector.extract_strided_slice %5 {offsets = [0, 0, 0, 5], sizes = [3, 2, 8, 1], strides = [1, 1, 1, 1]} : vector<3x2x8x8xf32> to vector<3x2x8x1xf32>
    %43 = vector.extract_strided_slice %0 {offsets = [0, 0, 5, 0], sizes = [3, 2, 1, 4], strides = [1, 1, 1, 1]} : vector<3x2x8x4xf32> to vector<3x2x1x4xf32>
    %44 = vector.broadcast %42 : vector<3x2x8x1xf32> to vector<3x2x8x4xf32>
    %45 = vector.broadcast %43 : vector<3x2x1x4xf32> to vector<3x2x8x4xf32>
    %46 = arith.mulf %44, %45 : vector<3x2x8x4xf32>
    %47 = arith.addf %41, %46 : vector<3x2x8x4xf32>
    %48 = vector.extract_strided_slice %5 {offsets = [0, 0, 0, 6], sizes = [3, 2, 8, 1], strides = [1, 1, 1, 1]} : vector<3x2x8x8xf32> to vector<3x2x8x1xf32>
    %49 = vector.extract_strided_slice %0 {offsets = [0, 0, 6, 0], sizes = [3, 2, 1, 4], strides = [1, 1, 1, 1]} : vector<3x2x8x4xf32> to vector<3x2x1x4xf32>
    %50 = vector.broadcast %48 : vector<3x2x8x1xf32> to vector<3x2x8x4xf32>
    %51 = vector.broadcast %49 : vector<3x2x1x4xf32> to vector<3x2x8x4xf32>
    %52 = arith.mulf %50, %51 : vector<3x2x8x4xf32>
    %53 = arith.addf %47, %52 : vector<3x2x8x4xf32>
    %54 = vector.extract_strided_slice %5 {offsets = [0, 0, 0, 7], sizes = [3, 2, 8, 1], strides = [1, 1, 1, 1]} : vector<3x2x8x8xf32> to vector<3x2x8x1xf32>
    %55 = vector.extract_strided_slice %0 {offsets = [0, 0, 7, 0], sizes = [3, 2, 1, 4], strides = [1, 1, 1, 1]} : vector<3x2x8x4xf32> to vector<3x2x1x4xf32>
    %56 = vector.broadcast %54 : vector<3x2x8x1xf32> to vector<3x2x8x4xf32>
    %57 = vector.broadcast %55 : vector<3x2x1x4xf32> to vector<3x2x8x4xf32>
    %58 = arith.mulf %56, %57 : vector<3x2x8x4xf32>
    %59 = arith.addf %53, %58 : vector<3x2x8x4xf32>
    %60 = vector.extract_strided_slice %3 {offsets = [0, 0, 0, 0], sizes = [3, 2, 8, 1], strides = [1, 1, 1, 1]} : vector<3x2x8x4xf32> to vector<3x2x8x1xf32>
    %61 = vector.broadcast %60 : vector<3x2x8x1xf32> to vector<3x2x8x4xf32>
    %62 = arith.mulf %61, %59 : vector<3x2x8x4xf32>
    %cst_19 = arith.constant dense<0.000000e+00> : vector<2x8x4xf32>
    %63 = vector.multi_reduction <add>, %62, %cst_19 [0] : vector<3x2x8x4xf32> to vector<2x8x4xf32>
    %cst_20 = arith.constant dense<0.000000e+00> : vector<2x4xf32>
    %64 = vector.multi_reduction <add>, %63, %cst_20 [1] : vector<2x8x4xf32> to vector<2x4xf32>
    %c0_21 = arith.constant 0 : index
    %c0_22 = arith.constant 0 : index
    %c0_23 = arith.constant 0 : index
    %65 = vector.load %arg5[%c0_21, %c0_22, %c0_23] : memref<4x2x4xf32, #tpu.memory_space<vmem>>, vector<1x2x4xf32>
    %66 = vector.shape_cast %65 : vector<1x2x4xf32> to vector<2x4xf32>
    %67 = vector.shape_cast %64 : vector<2x4xf32> to vector<1x2x4xf32>
    tpu.vector_store %arg5[%c0_21, %c0_22, %c0_23], %67 {strides = array<i32>} : memref<4x2x4xf32, #tpu.memory_space<vmem>>, vector<1x2x4xf32>,
    %68 = vector.extract_strided_slice %3 {offsets = [0, 0, 0, 1], sizes = [3, 2, 8, 1], strides = [1, 1, 1, 1]} : vector<3x2x8x4xf32> to vector<3x2x8x1xf32>
    %69 = vector.broadcast %68 : vector<3x2x8x1xf32> to vector<3x2x8x4xf32>
    %70 = arith.mulf %69, %59 : vector<3x2x8x4xf32>
    %cst_24 = arith.constant dense<0.000000e+00> : vector<2x8x4xf32>
    %71 = vector.multi_reduction <add>, %70, %cst_24 [0] : vector<3x2x8x4xf32> to vector<2x8x4xf32>
    %cst_25 = arith.constant dense<0.000000e+00> : vector<2x4xf32>
    %72 = vector.multi_reduction <add>, %71, %cst_25 [1] : vector<2x8x4xf32> to vector<2x4xf32>
    %c1 = arith.constant 1 : index
    %c0_26 = arith.constant 0 : index
    %c0_27 = arith.constant 0 : index
    %73 = vector.load %arg5[%c1, %c0_26, %c0_27] : memref<4x2x4xf32, #tpu.memory_space<vmem>>, vector<1x2x4xf32>
    %74 = vector.shape_cast %73 : vector<1x2x4xf32> to vector<2x4xf32>
    %75 = vector.shape_cast %72 : vector<2x4xf32> to vector<1x2x4xf32>
    tpu.vector_store %arg5[%c1, %c0_26, %c0_27], %75 {strides = array<i32>} : memref<4x2x4xf32, #tpu.memory_space<vmem>>, vector<1x2x4xf32>,
    %76 = vector.extract_strided_slice %3 {offsets = [0, 0, 0, 2], sizes = [3, 2, 8, 1], strides = [1, 1, 1, 1]} : vector<3x2x8x4xf32> to vector<3x2x8x1xf32>
    %77 = vector.broadcast %76 : vector<3x2x8x1xf32> to vector<3x2x8x4xf32>
    %78 = arith.mulf %77, %59 : vector<3x2x8x4xf32>
    %cst_28 = arith.constant dense<0.000000e+00> : vector<2x8x4xf32>
    %79 = vector.multi_reduction <add>, %78, %cst_28 [0] : vector<3x2x8x4xf32> to vector<2x8x4xf32>
    %cst_29 = arith.constant dense<0.000000e+00> : vector<2x4xf32>
    %80 = vector.multi_reduction <add>, %79, %cst_29 [1] : vector<2x8x4xf32> to vector<2x4xf32>
    %c2 = arith.constant 2 : index
    %c0_30 = arith.constant 0 : index
    %c0_31 = arith.constant 0 : index
    %81 = vector.load %arg5[%c2, %c0_30, %c0_31] : memref<4x2x4xf32, #tpu.memory_space<vmem>>, vector<1x2x4xf32>
    %82 = vector.shape_cast %81 : vector<1x2x4xf32> to vector<2x4xf32>
    %83 = vector.shape_cast %80 : vector<2x4xf32> to vector<1x2x4xf32>
    tpu.vector_store %arg5[%c2, %c0_30, %c0_31], %83 {strides = array<i32>} : memref<4x2x4xf32, #tpu.memory_space<vmem>>, vector<1x2x4xf32>,
    %84 = vector.extract_strided_slice %3 {offsets = [0, 0, 0, 3], sizes = [3, 2, 8, 1], strides = [1, 1, 1, 1]} : vector<3x2x8x4xf32> to vector<3x2x8x1xf32>
    %85 = vector.broadcast %84 : vector<3x2x8x1xf32> to vector<3x2x8x4xf32>
    %86 = arith.mulf %85, %59 : vector<3x2x8x4xf32>
    %cst_32 = arith.constant dense<0.000000e+00> : vector<2x8x4xf32>
    %87 = vector.multi_reduction <add>, %86, %cst_32 [0] : vector<3x2x8x4xf32> to vector<2x8x4xf32>
    %cst_33 = arith.constant dense<0.000000e+00> : vector<2x4xf32>
    %88 = vector.multi_reduction <add>, %87, %cst_33 [1] : vector<2x8x4xf32> to vector<2x4xf32>
    %c3 = arith.constant 3 : index
    %c0_34 = arith.constant 0 : index
    %c0_35 = arith.constant 0 : index
    %89 = vector.load %arg5[%c3, %c0_34, %c0_35] : memref<4x2x4xf32, #tpu.memory_space<vmem>>, vector<1x2x4xf32>
    %90 = vector.shape_cast %89 : vector<1x2x4xf32> to vector<2x4xf32>
    %91 = vector.shape_cast %88 : vector<2x4xf32> to vector<1x2x4xf32>
    tpu.vector_store %arg5[%c3, %c0_34, %c0_35], %91 {strides = array<i32>} : memref<4x2x4xf32, #tpu.memory_space<vmem>>, vector<1x2x4xf32>,
    return
  }
}

</mosaic_0001>

<bundles_post_ra>
// kernel: context_momentum_pallas.1
= control target key start
LH: loop header
LB: loop body
LE: loop exit
PB: predicated region body
PF: predicated region fallthrough
CT: control target
= control target key end

     0   :  { %v1559_v2 = vmov 2   ;;  %v1554_v3 = vmov 0   ;;  %s1548_s0 = inlined_call_operand.vmem [shape: f32[3,1,1,1], index: 0, kind: input, shape index: {}]   ;;  %s1549_s1 = inlined_call_operand.vmem [shape: f32[3,2,8,4], index: 1, kind: input, shape index: {}]   ;;  %s1550_s2 = inlined_call_operand.vmem [shape: f32[3,2,8,1], index: 2, kind: input, shape index: {}]   ;;  %s1551_s3 = inlined_call_operand.vmem [shape: f32[3,2,8,8], index: 3, kind: input, shape index: {}]   ;;  %s1552_s4 = inlined_call_operand.hbm [shape: f32[2,4], index: 4, kind: output, shape index: {0}]   ;;  %s1553_s5 = inlined_call_operand.vmem [shape: f32[4,2,4], index: 5, kind: output, shape index: {1}]  }
   0x1   :  { %v999_v0 = vld [vmem:[%s1551_s3] sm:$0xff]  ;;  %908 = vset.pattern.permute.xlu0 %v1559_v2  ;;  %906 = vset.pattern.permute.xlu1 %v1554_v3  ;;  %v1010_v4 = vld [vmem:[%s1551_s3 + $0x18] sm:$0xff] }
   0x2   :  { %v893_v1 = vld [vmem:[%s1548_s0 + $0x2] ss:$0 sm:$0xff]  ;;  %269 = vperm.xlu0 %908, %v999_v0  }
   0x3   :  { %53 = vperm.xlu1 %906, %v893_v1   ;;  %v62_v5 = vld [vmem:[%s1550_s2] sm:$0xff] }
   0x6   :  { %281 = vperm.xlu0 %908, %v1010_v4  }
   0x7   :  { %76 = vperm.xlu1 %906, %v62_v5  }
   0x8   :  { %11 = vsyncpa [#allocation3], 0  ;;  %v1019_v6 = vld [vmem:[%s1551_s3 + $0x28] sm:$0xff]  ;;  %v64_v7 = vld [vmem:[%s1550_s2 + $0x10] sm:$0xff]  ;;  %v1555_v10 = vmov 3   ;;  %v960_v13 = vmov 4   ;;  %v172_v31 = vlaneseq }
   0x9   :  { %v66_v8 = vld [vmem:[%s1550_s2 + $0x20] sm:$0xff]  ;;  %v1031_v9 = vld [vmem:[%s1551_s3 + $0x8] sm:$0xff]  ;;  %v1045_v12 = vld [vmem:[%s1551_s3 + $0x10] sm:$0xff]  ;;  %v1557_v14 = vmov 1   ;;  %v962_v15 = vmov 5   ;;  %v963_v16 = vmov 6  }
   0xa   :  { %289 = vperm.xlu0 %908, %v1019_v6   ;;  %v1038_v11 = vld [vmem:[%s1551_s3 + $0x20] sm:$0xff]  ;;  %v964_v17 = vmov 7   ;;  %v63_v20 = vld [vmem:[%s1550_s2 + $0x8] sm:$0xff]  ;;  %v65_v21 = vld [vmem:[%s1550_s2 + $0x18] sm:$0xff]  ;;  %v1123_v34 = vshrl.u32 %v172_v31, 7  ;;  %vm110_vm0 = vcmask 31744  }
   0xb   :  { %86 = vperm.xlu1 %906, %v64_v7   ;;  %v891_v18 = vld [vmem:[%s1548_s0] ss:$0 sm:$0xff]  ;;  %v892_v19 = vld [vmem:[%s1548_s0 + $0x1] ss:$0 sm:$0xff]  ;;  %v67_v22 = vld [vmem:[%s1550_s2 + $0x28] sm:$0xff]  ;;  %vm137_vm1 = vcmask 1041409  }
   0xc   :  { %v1126_v35 = vsub.s32 0, %v1123_v34  ;;  %v1129_v38 = vsub.s32 1, %v1123_v34  ;;  %v1134_v39 = vld [vmem:[%s1549_s1] sm:$0xff]  ;;  %v1137_v40 = vsub.s32 2, %v1123_v34  ;;  %v1146_v43 = vld [vmem:[%s1549_s1 + $0x10] sm:$0xff]  ;;  %vm140_vm2 = vcmask 25600  }
   0xe   :  { %911 = vset.pattern.permute.xlu0 %v1555_v10  ;;  %v175_v41 = vrot.slane %v1134_v39, %v1126_v35  ;;  %v235_v45 = vrot.slane %v1134_v39, %v1129_v38  ;;  %v295_v46 = vrot.slane %v1134_v39, %v1137_v40  ;;  %v183_v48 = vrot.slane %v1146_v43, %v1126_v35 }
   0xf   :  { %96 = vperm.xlu1 %906, %v66_v8   ;;  %333 = vperm.xlu0 %911, %v1031_v9   ;;  %v243_v52 = vrot.slane %v1146_v43, %v1129_v38 }
  0x13   :  { %144 = vperm.xlu1 %906, %v999_v0   ;;  %345 = vperm.xlu0 %911, %v1038_v11  }
  0x17   :  { %154 = vperm.xlu1 %906, %v1045_v12   ;;  %912 = vset.pattern.permute.xlu0 %v960_v13 }
  0x18   :  { %389 = vperm.xlu0 %912, %v999_v0  }
  0x1b   :  { %164 = vperm.xlu1 %906, %v1038_v11  }
  0x1c   :  { %401 = vperm.xlu0 %912, %v1010_v4  }
  0x1f   :  { %907 = vset.pattern.permute.xlu1 %v1557_v14 }
  0x20   :  { %209 = vperm.xlu1 %907, %v999_v0   ;;  %409 = vperm.xlu0 %912, %v1019_v6  }
  0x24   :  { %217 = vperm.xlu1 %907, %v1045_v12   ;;  %915 = vset.pattern.permute.xlu0 %v962_v15 }
  0x25   :  { %453 = vperm.xlu0 %915, %v1031_v9  }
  0x28   :  { %221 = vperm.xlu1 %907, %v1010_v4  }
  0x29   :  { %465 = vperm.xlu0 %915, %v1038_v11  }
  0x2c   :  { %229 = vperm.xlu1 %907, %v1019_v6  }
  0x2d   :  { %916 = vset.pattern.permute.xlu0 %v963_v16 }
  0x2e   :  { %509 = vperm.xlu0 %916, %v999_v0  }
  0x30   :  { %909 = vset.pattern.permute.xlu1 %v1559_v2 }
  0x31   :  { %273 = vperm.xlu1 %909, %v1031_v9  }
  0x32   :  { %521 = vperm.xlu0 %916, %v1010_v4  }
  0x35   :  { %277 = vperm.xlu1 %909, %v1045_v12  }
  0x36   :  { %529 = vperm.xlu0 %916, %v1019_v6  }
  0x39   :  { %285 = vperm.xlu1 %909, %v1038_v11  }
  0x3a   :  { %919 = vset.pattern.permute.xlu0 %v964_v17 }
  0x3b   :  { %573 = vperm.xlu0 %919, %v1031_v9  }
  0x3d   :  { %910 = vset.pattern.permute.xlu1 %v1555_v10 }
  0x3e   :  { %329 = vperm.xlu1 %910, %v999_v0  }
  0x3f   :  { %585 = vperm.xlu0 %919, %v1038_v11  }
  0x42   :  { %337 = vperm.xlu1 %910, %v1045_v12  }
  0x43   :  { %920 = vset.pattern.permute.xlu0 %v1554_v3 }
  0x44   :  { %45 = vperm.xlu0 %920, %v891_v18  }
  0x46   :  { %341 = vperm.xlu1 %910, %v1010_v4  }
  0x48   :  { %49 = vperm.xlu0 %920, %v892_v19  }
  0x4a   :  { %349 = vperm.xlu1 %910, %v1019_v6  }
  0x4c   :  { %81 = vperm.xlu0 %920, %v63_v20  }
  0x4e   :  { %913 = vset.pattern.permute.xlu1 %v960_v13  ;;  %v1179_v13 = vsub.s32 3, %v1123_v34 }
  0x4f   :  { %393 = vperm.xlu1 %913, %v1031_v9  }
  0x50   :  { %91 = vperm.xlu0 %920, %v65_v21  }
  0x53   :  { %397 = vperm.xlu1 %913, %v1045_v12  }
  0x54   :  { %101 = vperm.xlu0 %920, %v67_v22   ;;  %v363_v22 = vrot.slane %v1146_v43, %v1179_v13 }
  0x57   :  { %405 = vperm.xlu1 %913, %v1038_v11  }
  0x58   :  { %149 = vperm.xlu0 %920, %v1031_v9  }
  0x5b   :  { %914 = vset.pattern.permute.xlu1 %v962_v15  ;;  %v1182_v15 = vsub.s32 4, %v1123_v34 }
  0x5c   :  { %449 = vperm.xlu1 %914, %v999_v0   ;;  %159 = vperm.xlu0 %920, %v1010_v4  }
  0x5d   :  { %v415_v19 = vrot.slane %v1134_v39, %v1182_v15 }
  0x60   :  { %457 = vperm.xlu1 %914, %v1045_v12   ;;  %169 = vperm.xlu0 %920, %v1019_v6  }
  0x64   :  { %461 = vperm.xlu1 %914, %v1010_v4  }
  0x68   :  { %469 = vperm.xlu1 %914, %v1019_v6  }
  0x6c   :  { %917 = vset.pattern.permute.xlu1 %v963_v16 }
  0x6d   :  { %513 = vperm.xlu1 %917, %v1031_v9  }
  0x71   :  { %517 = vperm.xlu1 %917, %v1045_v12  }
  0x75   :  { %525 = vperm.xlu1 %917, %v1038_v11  }
  0x79   :  { %918 = vset.pattern.permute.xlu1 %v964_v17  ;;  %v355_v17 = vrot.slane %v1134_v39, %v1179_v13 }
  0x7a   :  { %569 = vperm.xlu1 %918, %v999_v0  }
  0x7e   :  { %577 = vperm.xlu1 %918, %v1045_v12  }
  0x81   :  { %v270_v23 = vpop.permute.xlu0 %269 }
  0x82   :  { %581 = vperm.xlu1 %918, %v1010_v4   ;;  %v1105_v24 = vpop.permute.xlu1 %53  ;;  %v316_v53 = vmul.f32 %v295_v46, %v270_v23  ;;  %v303_v4 = vrot.slane %v1146_v43, %v1137_v40  ;;  %v1201_v46 = vld [vmem:[%s1549_s1 + $0x8] sm:$0xff] }
  0x85   :  { %v1107_v25 = vpop.permute.xlu0 %281 }
  0x86   :  { %589 = vperm.xlu1 %918, %v1019_v6   ;;  %v1110_v26 = vpop.permute.xlu1 %76 }
  0x89   :  { %v1112_v27 = vpop.permute.xlu0 %289 }
  0x8a   :  { %v1114_v28 = vpop.permute.xlu1 %86  ;;  %921 = vset.pattern.permute.xlu1 %v1554_v3 }
  0x8e   :  { %v1117_v29 = vpop.permute.xlu1 %96  ;;  %v1119_v30 = vpop.permute.xlu0 %333 }
  0x8f   :  { %1561 = vst [vmem:[#allocation5_spill] sm:$0xff] %v1119_v30 }
  0x92   :  { %v145_v32 = vpop.permute.xlu1 %144  ;;  %v1121_v33 = vpop.permute.xlu0 %345 }
  0x93   :  { %1562 = vst [vmem:[#allocation6_spill] sm:$0xff] %v1121_v33  ;;  %v196_v47 = vmul.f32 %v175_v41, %v145_v32 }
  0x96   :  { %v155_v36 = vpop.permute.xlu1 %154 }
  0x97   :  { %v390_v37 = vpop.permute.xlu0 %389  ;;  %v198_v54 = vmul.f32 %v183_v48, %v155_v36 }
  0x98   :  { %v436_v31 = vmul.f32 %v415_v19, %v390_v37  ;;  %v1214_v37 = vld [vmem:[%s1549_s1 + $0x20] sm:$0xff]  ;;  %v423_v19 = vrot.slane %v1146_v43, %v1182_v15 }
  0x9a   :  { %v1141_v42 = vpop.permute.xlu1 %164 }
  0x9b   :  { %1563 = vst [vmem:[#allocation7_spill] sm:$0xff] %v1141_v42  ;;  %v1148_v44 = vpop.permute.xlu0 %401 }
  0x9f   :  { %v210_v49 = vpop.permute.xlu1 %209  ;;  %v1156_v51 = vpop.permute.xlu0 %409 }
  0xa0   :  { %v256_v50 = vmul.f32 %v235_v45, %v210_v49 }
  0xa2   :  { %v262_v55 = vadd.f32 %v256_v50, %v196_v47 }
  0xa3   :  { %v218_v56 = vpop.permute.xlu1 %217 }
  0xa4   :  { %v258_v57 = vmul.f32 %v243_v52, %v218_v56  ;;  %v322_v58 = vadd.f32 %v316_v53, %v262_v55  ;;  %v1160_v59 = vpop.permute.xlu0 %453  ;;  %v1218_v53 = vmul.f32 %v1105_v24, %v1214_v37 }
  0xa5   :  { %1564 = vst [vmem:[#allocation8_spill] sm:$0xff] %v1160_v59 }
  0xa6   :  { %v264_v60 = vadd.f32 %v258_v57, %v198_v54 }
  0xa7   :  { %v1162_v61 = vpop.permute.xlu1 %221 }
  0xa8   :  { %v1164_v62 = vpop.permute.xlu0 %465 }
  0xa9   :  { %1565 = vst [vmem:[#allocation9_spill] sm:$0xff] %v1164_v62 }
  0xab   :  { %v1166_v63 = vpop.permute.xlu1 %229 }
  0xad   :  { %v1168_v0 = vpop.permute.xlu0 %509 }
  0xb0   :  { %v1170_v1 = vpop.permute.xlu1 %273 }
  0xb1   :  { %v1174_v5 = vpop.permute.xlu0 %521 }
  0xb4   :  { %v278_v6 = vpop.permute.xlu1 %277 }
  0xb5   :  { %v318_v7 = vmul.f32 %v303_v4, %v278_v6  ;;  %v1176_v8 = vpop.permute.xlu0 %529 }
  0xb7   :  { %v324_v12 = vadd.f32 %v318_v7, %v264_v60 }
  0xb8   :  { %v1184_v16 = vpop.permute.xlu1 %285 }
  0xb9   :  { %1566 = vst [vmem:[#allocation10_spill] sm:$0xff] %v1184_v16 }
  0xba   :  { %v1188_v18 = vpop.permute.xlu0 %573 }
  0xbb   :  { %1567 = vst [vmem:[#allocation11_spill] sm:$0xff] %v1188_v18  ;;  %v1571_v18 = vmov 2  }
  0xbd   :  { %v330_v20 = vpop.permute.xlu1 %329 }
  0xbe   :  { %v376_v21 = vmul.f32 %v355_v17, %v330_v20  ;;  %v1194_v23 = vpop.permute.xlu0 %585 }
  0xbf   :  { %1568 = vst [vmem:[#allocation12_spill] sm:$0xff] %v1194_v23 }
  0xc0   :  { %v382_v32 = vadd.f32 %v376_v21, %v322_v58  ;;  %v108_v58 = vmul.f32 %v1117_v29, %v1218_v53 }
  0xc1   :  { %v338_v36 = vpop.permute.xlu1 %337 }
  0xc2   :  { %v378_v41 = vmul.f32 %v363_v22, %v338_v36  ;;  %v1196_v45 = vadd.f32 %v436_v31, %v382_v32  ;;  %v114_v17 = vsel %vm110_vm0, %v108_v58, 0.0  ;;  %v1259_v32 = vld [vmem:[%s1549_s1 + $0x28] sm:$0xff] }
  0xc3   :  { %v46_v48 = vpop.permute.xlu0 %45  ;;  %v195_v62 = vrot.slane %v1259_v32, %v1126_v35  ;;  %v435_v33 = vrot.slane %v1259_v32, %v1182_v15 }
  0xc4   :  { %v384_v47 = vadd.f32 %v378_v41, %v324_v12  ;;  %v1204_v49 = vmul.f32 %v46_v48, %v1134_v39  ;;  %v1207_v50 = vmul.f32 %v46_v48, %v1201_v46  ;;  %v1264_v48 = vmul.f32 %v1105_v24, %v1259_v32 }
  0xc5   :  { %v1209_v52 = vpop.permute.xlu1 %341  ;;  %v1273_v24 = vsub.s32 5, %v1123_v34 }
  0xc6   :  { %635 = vperm.xlu1 %921, %v1207_v50   ;;  %630 = vperm.xlu0 %920, %v1204_v49   ;;  %v104_v55 = vmul.f32 %v1110_v26, %v1204_v49  ;;  %v1239_v26 = vld [vmem:[%s1549_s1 + $0x18] sm:$0xff]  ;;  %s965_s1 = smov [#allocation2]  }
  0xc7   :  { %v50_v54 = vpop.permute.xlu0 %49  ;;  %s879_s7 = sshll.u32 %s965_s1, 4  ;;  %s880_s7 = int_to_ptr.vmem [resolvable:$true] %s879_s7 }
  0xc8   :  { %v1225_v56 = vmul.f32 %v50_v54, %v1146_v43  ;;  %v111_v6 = vsel %vm110_vm0, %v104_v55, 0.0  ;;  %v1244_v7 = vmul.f32 %v50_v54, %v1239_v26  ;;  %s933_s8 = scalar_lea.vmem %s880_s7, 32  ;;  %p938_p1 = scmp.lt.s32.totalorder %s880_s7, %s880_s7 }
  0xc9   :  { %v1227_v57 = vpop.permute.xlu1 %349  ;;  %p934_p0 = scmp.ne.s32.totalorder %s880_s7, %s933_s8  ;;  %p939_p2 = scmp.lt.s32.totalorder %s933_s8, %s933_s8 }
  0xca   :  { %v106_v60 = vmul.f32 %v1114_v28, %v1225_v56  ;;  %640 = vperm.xlu1 %921, %v1225_v56   ;;  %923 = vset.pattern.permute.xlu0 %v1559_v2 }
  0xcb   :  { %v82_v4 = vpop.permute.xlu0 %81  ;;  %754 = vperm.xlu0 %923, %v1204_v49   ;;  %p940_p3 = por %p939_p2, %p938_p1 }
  0xcc   :  { %v112_v29 = vsel %vm110_vm0, %v106_v60, 0.0  ;;  %v105_v22 = vmul.f32 %v82_v4, %v1207_v50 }
  0xcd   :  { %v113_v12 = vadd.f32 %v112_v29, %v111_v6  ;;  %p941_p4 = pnand %p940_p3, %p934_p0 }
  0xce   :  { %v1246_v28 = vpop.permute.xlu1 %393  ;;  %922 = vset.pattern.permute.xlu1 %v1557_v14  ;;  %v116_v4 = vsel %vm110_vm0, %v105_v22, 0.0  ;;  %v255_v14 = vrot.slane %v1259_v32, %v1129_v38 }
  0xcf   :  { %1569 = vst [vmem:[#allocation13_spill] sm:$0xff] %v1246_v28  ;;  %v92_v20 = vpop.permute.xlu0 %91  ;;  %694 = vperm.xlu1 %922, %v1204_v49   ;;  %766 = vperm.xlu0 %923, %v1244_v7   ;;  %v115_v21 = vadd.f32 %v114_v17, %v113_v12  ;;  %v1276_v17 = vsub.s32 6, %v1123_v34 }
  0xd0   :  { %v107_v31 = vmul.f32 %v92_v20, %v1244_v7 }
  0xd1   :  { %v121_v41 = vsel %vm110_vm0, %v115_v21, 0.0  ;;  %v247_v21 = vrot.slane %v1239_v26, %v1129_v38 }
  0xd2   :  { %v398_v36 = vpop.permute.xlu1 %397  ;;  %v117_v54 = vsel %vm110_vm0, %v107_v31, 0.0  ;;  %v122_v58 = vrot.slane %v121_v41, 4 }
  0xd3   :  { %v438_v55 = vmul.f32 %v423_v19, %v398_v36  ;;  %v102_v60 = vpop.permute.xlu0 %101  ;;  %702 = vperm.xlu1 %922, %v1225_v56   ;;  %925 = vset.pattern.permute.xlu0 %v1554_v3  ;;  %v118_v19 = vadd.f32 %v117_v54, %v116_v4  ;;  %v475_v36 = vrot.slane %v1134_v39, %v1273_v24 }
  0xd4   :  { %v109_v29 = vmul.f32 %v102_v60, %v1264_v48  ;;  %645 = vperm.xlu0 %925, %v1244_v7   ;;  %v123_v12 = vadd.f32 %v122_v58, %v121_v41  ;;  %v187_v41 = vrot.slane %v1239_v26, %v1126_v35  ;;  %v315_v58 = vrot.slane %v1259_v32, %v1137_v40 }
  0xd5   :  { %v444_v6 = vadd.f32 %v438_v55, %v384_v47  ;;  %v307_v55 = vrot.slane %v1239_v26, %v1137_v40  ;;  %v535_v60 = vrot.slane %v1134_v39, %v1276_v17 }
  0xd6   :  { %v1278_v20 = vpop.permute.xlu1 %405  ;;  %v119_v22 = vsel %vm110_vm0, %v109_v29, 0.0  ;;  %v124_v54 = vrot.slane %v123_v12, 2  ;;  %v427_v29 = vrot.slane %v1239_v26, %v1182_v15 }
  0xd7   :  { %1570 = vst [vmem:[#allocation14_spill] sm:$0xff] %v1278_v20  ;;  %v120_v47 = vadd.f32 %v119_v22, %v118_v19  ;;  %v1283_v31 = vpop.permute.xlu0 %149  ;;  %706 = vperm.xlu1 %922, %v1244_v7   ;;  %v259_v19 = vmul.f32 %v247_v21, %v1162_v61  ;;  %v367_v22 = vrot.slane %v1239_v26, %v1179_v13  ;;  %v1572_v21 = vmov 1  }
  0xd8   :  { %650 = vperm.xlu0 %925, %v1218_v53   ;;  %v125_v59 = vadd.f32 %v124_v54, %v123_v12  ;;  %v261_v12 = vmul.f32 %v255_v14, %v1166_v63  ;;  %v547_v14 = vrot.slane %v1239_v26, %v1276_v17 }
  0xd9   :  { %v128_v4 = vsel %vm110_vm0, %v120_v47, 0.0  ;;  %v483_v47 = vrot.slane %v1146_v43, %v1273_v24 }
  0xda   :  { %v129_v3 = vrot.slane %v128_v4, 4 }
  0xdb   :  { %v450_v10 = vpop.permute.xlu1 %449  ;;  %v160_v23 = vpop.permute.xlu0 %159  ;;  %924 = vset.pattern.permute.xlu1 %v1571_v18 }
  0xdc   :  { %v496_v2 = vmul.f32 %v475_v36, %v450_v10  ;;  %v130_v20 = vadd.f32 %v129_v3, %v128_v4  ;;  %v199_v61 = vmul.f32 %v187_v41, %v160_v23  ;;  %758 = vperm.xlu1 %924, %v1207_v50   ;;  %927 = vset.pattern.permute.xlu0 %v1572_v21 }
  0xdd   :  { %v556_v10 = vmul.f32 %v535_v60, %v1168_v0  ;;  %v375_v36 = vrot.slane %v1259_v32, %v1179_v13  ;;  %213 = vperm.xlu0 %927, %v1031_v9   ;;  %v319_v3 = vmul.f32 %v307_v55, %v1107_v25  ;;  %v379_v23 = vmul.f32 %v367_v22, %v1209_v52 }
  0xde   :  { %v502_v28 = vadd.f32 %v496_v2, %v1196_v45  ;;  %v131_v41 = vrot.slane %v130_v20, 2  ;;  %v265_v4 = vadd.f32 %v259_v19, %v199_v61  ;;  %v487_v0 = vrot.slane %v1239_v26, %v1273_v24 }
  0xdf   :  { %v458_v16 = vpop.permute.xlu1 %457  ;;  %v170_v42 = vpop.permute.xlu0 %169  ;;  %v126_v9 = vrot.slane %v125_v59, 1  ;;  %v321_v25 = vmul.f32 %v315_v58, %v1112_v27  ;;  %v439_v52 = vmul.f32 %v427_v29, %v1148_v44  ;;  %v495_v19 = vrot.slane %v1259_v32, %v1273_v24 }
  0xe0   :  { %v498_v54 = vmul.f32 %v483_v47, %v458_v16  ;;  %v1324_v60 = vadd.f32 %v556_v10, %v502_v28  ;;  %v132_v30 = vadd.f32 %v131_v41, %v130_v20  ;;  %v325_v2 = vadd.f32 %v319_v3, %v265_v4  ;;  %762 = vperm.xlu1 %924, %v1225_v56  }
  0xe1   :  { %v201_v45 = vmul.f32 %v195_v62, %v170_v42  ;;  %225 = vperm.xlu0 %927, %v1038_v11   ;;  %v381_v16 = vmul.f32 %v375_v36, %v1227_v57  ;;  %v1573_v58 = vmov 3   ;;  %v441_v11 = vmul.f32 %v435_v33, %v1156_v51 }
  0xe2   :  { %v1331_v63 = vadd.f32 %v498_v54, %v444_v6  ;;  %v385_v55 = vadd.f32 %v379_v23, %v325_v2  ;;  %v133_v42 = vrot.slane %v132_v30, 1  ;;  %v127_v6 = vadd.f32 %v126_v9, %v125_v59 }
  0xe3   :  { %v267_v28 = vadd.f32 %v261_v12, %v201_v45  ;;  %v462_v20 = vpop.permute.xlu1 %461  ;;  %v555_v57 = vrot.slane %v1259_v32, %v1276_v17  ;;  %v559_v22 = vmul.f32 %v547_v14, %v1174_v5  ;;  %v1574_v5 = vmov 0  }
  0xe4   :  { %v499_v62 = vmul.f32 %v487_v0, %v462_v20  ;;  %v445_v44 = vadd.f32 %v439_v52, %v385_v55  ;;  %926 = vset.pattern.permute.xlu1 %v1573_v58  ;;  %v134_v29 = vadd.f32 %v133_v42, %v132_v30 }
  0xe5   :  { %v327_v27 = vadd.f32 %v321_v25, %v267_v28  ;;  %814 = vperm.xlu1 %926, %v1204_v49   ;;  %698 = vperm.xlu0 %927, %v1207_v50   ;;  %v561_v33 = vmul.f32 %v555_v57, %v1176_v8 }
  0xe6   :  { %v505_v47 = vadd.f32 %v499_v62, %v445_v44  ;;  %v138_v36 = vsel %vm137_vm1, %v134_v29, %v127_v6 }
  0xe7   :  { %v470_v61 = vpop.permute.xlu1 %469  ;;  %v387_v10 = vadd.f32 %v381_v16, %v327_v27  ;;  %141 = vst.msk [vmem:[#allocation2] sm:$0x3] %vm140_vm2, %v138_v36 }
  0xe8   :  { %v501_v3 = vmul.f32 %v495_v19, %v470_v61  ;;  %v1346_v59 = vadd.f32 %v559_v22, %v505_v47 }
  0xe9   :  { %v447_v30 = vadd.f32 %v441_v11, %v387_v10  ;;  %822 = vperm.xlu1 %926, %v1225_v56   ;;  %714 = vperm.xlu0 %927, %v1264_v48  }
  0xeb   :  { %v507_v51 = vadd.f32 %v501_v3, %v447_v30 }
  0xed   :  { %v1351_v49 = vadd.f32 %v561_v33, %v507_v51  ;;  %826 = vperm.xlu1 %926, %v1244_v7   ;;  %930 = vset.pattern.permute.xlu0 %v1573_v58 }
  0xee   :  { %818 = vperm.xlu0 %930, %v1207_v50  }
  0xf1   :  { %928 = vset.pattern.permute.xlu1 %v1574_v5 }
  0xf2   :  { %655 = vperm.xlu1 %928, %v1264_v48   ;;  %830 = vperm.xlu0 %930, %v1218_v53  }
  0xf6   :  { %929 = vset.pattern.permute.xlu1 %v1572_v21 }
  0xf7   :  { %710 = vperm.xlu1 %929, %v1218_v53  }
  0xfb   :  { %931 = vset.pattern.permute.xlu1 %v1571_v18 }
  0xfc   :  { %770 = vperm.xlu1 %931, %v1218_v53  }
 0x100   :  { %774 = vperm.xlu1 %931, %v1264_v48  }
 0x104   :  { %932 = vset.pattern.permute.xlu1 %v1573_v58 }
 0x105   :  { %834 = vperm.xlu1 %932, %v1264_v48  }
 0x106   :  { %944 = shalt.err (!%p941_p4)
}
 0x107   :  { %s945_s11 = scalar_lea.hbm %s1552_s4, 32 }
 0x108   :  { %p946_p5 = scmp.ne.s32.totalorder %s1552_s4, %s945_s11  ;;  %p949_p6 = scmp.lt.u32.totalorder %s945_s11, %s1552_s4 }
 0x10a   :  { %p951_p7 = pnand %p949_p6, %p946_p5 }
 0x10c   :  { %954 = shalt.err (!%p951_p7)
}
 0x10d   :  { %882 = dma.vmem_to_hbm [thread:$0]  %s880_s7, 32, %s1552_s4, [#allocation3]   ;;  %v1378_v8 = vpop.permute.xlu1 %513  ;;  %v1383_v48 = vsub.s32 7, %v1123_v34  ;;  %v543_v21 = vrot.slane %v1146_v43, %v1276_v17  ;;  %v179_v11 = vrot.slane %v1201_v46, %v1126_v35  ;;  %v239_v57 = vrot.slane %v1201_v46, %v1129_v38 }
 0x10e   :  { %v299_v22 = vrot.slane %v1201_v46, %v1137_v40  ;;  %v359_v61 = vrot.slane %v1201_v46, %v1179_v13  ;;  %v191_v36 = vrot.slane %v1214_v37, %v1126_v35  ;;  %v251_v33 = vrot.slane %v1214_v37, %v1129_v38 }
 0x10f   :  { %v595_v23 = vrot.slane %v1134_v39, %v1383_v48  ;;  %v603_v41 = vrot.slane %v1146_v43, %v1383_v48  ;;  %v197_v3 = vmul.f32 %v179_v11, %v1283_v31  ;;  %v371_v51 = vrot.slane %v1214_v37, %v1179_v13  ;;  %v1579_v11 = vld [vmem:[#allocation6_spill] sm:$0xff] }
 0x110   :  { %v311_v5 = vrot.slane %v1214_v37, %v1137_v40  ;;  %v479_v35 = vrot.slane %v1201_v46, %v1273_v24  ;;  %v317_v31 = vmul.f32 %v299_v22, %v1170_v1  ;;  %v431_v13 = vrot.slane %v1214_v37, %v1182_v15  ;;  %v1576_v1 = vld [vmem:[#allocation7_spill] sm:$0xff] }
 0x111   :  { %v518_v18 = vpop.permute.xlu1 %517  ;;  %v539_v40 = vrot.slane %v1201_v46, %v1276_v17 }
 0x112   :  { %v558_v12 = vmul.f32 %v543_v21, %v518_v18  ;;  %v607_v18 = vrot.slane %v1239_v26, %v1383_v48  ;;  %v615_v26 = vrot.slane %v1259_v32, %v1383_v48 }
 0x114   :  { %v564_v34 = vadd.f32 %v558_v12, %v1331_v63  ;;  %v1575_v12 = vld [vmem:[#allocation5_spill] sm:$0xff] }
 0x115   :  { %v1380_v50 = vpop.permute.xlu1 %525 }
 0x119   :  { %v570_v53 = vpop.permute.xlu1 %569 }
 0x11a   :  { %v616_v54 = vmul.f32 %v595_v23, %v570_v53 }
 0x11c   :  { %v1397_v9 = vadd.f32 %v616_v54, %v1324_v60  ;;  %v377_v54 = vmul.f32 %v359_v61, %v1575_v12  ;;  %v1584_v12 = vld [vmem:[#allocation12_spill] sm:$0xff] }
 0x11d   :  { %v578_v56 = vpop.permute.xlu1 %577 }
 0x11e   :  { %v618_v0 = vmul.f32 %v603_v41, %v578_v56  ;;  %v419_v56 = vrot.slane %v1201_v46, %v1182_v15 }
 0x120   :  { %v1399_v25 = vadd.f32 %v618_v0, %v564_v34  ;;  %v200_v0 = vmul.f32 %v191_v36, %v1576_v1  ;;  %v1581_v36 = vld [vmem:[#allocation14_spill] sm:$0xff] }
 0x121   :  { %v582_v7 = vpop.permute.xlu1 %581 }
 0x125   :  { %v1391_v4 = vpop.permute.xlu1 %589 }
 0x145   :  { %v1393_v2 = vpop.permute.xlu1 %635  ;;  %v631_v45 = vpop.permute.xlu0 %630 }
 0x146   :  { %v658_v39 = vmul.f32 %v631_v45, %v1397_v9 }
 0x148   :  { %v664_v16 = vsel %vm110_vm0, %v658_v39, 0.0  ;;  %v1577_v39 = vld [vmem:[#allocation10_spill] sm:$0xff] }
 0x149   :  { %v641_v52 = vpop.permute.xlu1 %640 }
 0x14a   :  { %v660_v43 = vmul.f32 %v641_v52, %v1399_v25  ;;  %v755_v14 = vpop.permute.xlu0 %754  ;;  %v320_v52 = vmul.f32 %v311_v5, %v1577_v39  ;;  %v557_v5 = vmul.f32 %v539_v40, %v1378_v8 }
 0x14b   :  { %v777_v53 = vmul.f32 %v755_v14, %v1397_v9 }
 0x14c   :  { %v665_v28 = vsel %vm110_vm0, %v660_v43, 0.0  ;;  %v619_v43 = vmul.f32 %v607_v18, %v582_v7  ;;  %v380_v7 = vmul.f32 %v371_v51, %v1579_v11  ;;  %v1582_v51 = vld [vmem:[#allocation9_spill] sm:$0xff] }
 0x14d   :  { %v1405_v20 = vadd.f32 %v665_v28, %v664_v16  ;;  %v783_v15 = vsel %vm110_vm0, %v777_v53, 0.0  ;;  %v1578_v16 = vld [vmem:[#allocation13_spill] sm:$0xff] }
 0x14e   :  { %v695_v55 = vpop.permute.xlu1 %694  ;;  %v1407_v42 = vpop.permute.xlu0 %766  ;;  %v437_v28 = vmul.f32 %v419_v56, %v1578_v16 }
 0x14f   :  { %v717_v60 = vmul.f32 %v695_v55, %v1397_v9 }
 0x151   :  { %v723_v27 = vsel %vm110_vm0, %v717_v60, 0.0 }
 0x152   :  { %v703_v63 = vpop.permute.xlu1 %702 }
 0x153   :  { %v719_v62 = vmul.f32 %v703_v63, %v1399_v25  ;;  %v1411_v19 = vpop.permute.xlu0 %645  ;;  %v491_v63 = vrot.slane %v1214_v37, %v1273_v24  ;;  %v621_v24 = vmul.f32 %v615_v26, %v1391_v4 }
 0x155   :  { %v724_v44 = vsel %vm110_vm0, %v719_v62, 0.0  ;;  %v599_v62 = vrot.slane %v1201_v46, %v1383_v48  ;;  %v1484_v40 = vadd.f32 %v621_v24, %v1351_v49 }
 0x156   :  { %v1415_v58 = vadd.f32 %v724_v44, %v723_v27  ;;  %v1417_v6 = vpop.permute.xlu1 %706 }
 0x157   :  { %v1419_v29 = vpop.permute.xlu0 %650 }
 0x15b   :  { %v1427_v47 = vpop.permute.xlu1 %758 }
 0x15c   :  { %v214_v10 = vpop.permute.xlu0 %213 }
 0x15d   :  { %v257_v30 = vmul.f32 %v239_v57, %v214_v10  ;;  %v1580_v57 = vld [vmem:[#allocation8_spill] sm:$0xff] }
 0x15e   :  { %v497_v22 = vmul.f32 %v479_v35, %v1580_v57  ;;  %v611_v35 = vrot.slane %v1214_v37, %v1383_v48 }
 0x15f   :  { %v263_v38 = vadd.f32 %v257_v30, %v197_v3  ;;  %v763_v21 = vpop.permute.xlu1 %762  ;;  %v440_v3 = vmul.f32 %v431_v13, %v1581_v36  ;;  %v551_v30 = vrot.slane %v1214_v37, %v1276_v17  ;;  %v1583_v17 = vld [vmem:[#allocation11_spill] sm:$0xff] }
 0x160   :  { %v779_v23 = vmul.f32 %v763_v21, %v1399_v25  ;;  %v226_v41 = vpop.permute.xlu0 %225  ;;  %v617_v13 = vmul.f32 %v599_v62, %v1583_v17 }
 0x161   :  { %v323_v45 = vadd.f32 %v317_v31, %v263_v38  ;;  %v260_v34 = vmul.f32 %v251_v33, %v226_v41  ;;  %v625_v33 = vadd.f32 %v619_v43, %v1346_v59  ;;  %v500_v31 = vmul.f32 %v491_v63, %v1582_v51 }
 0x162   :  { %v784_v14 = vsel %vm110_vm0, %v779_v23, 0.0  ;;  %v560_v8 = vmul.f32 %v551_v30, %v1380_v50 }
 0x163   :  { %v383_v55 = vadd.f32 %v377_v54, %v323_v45  ;;  %v1461_v32 = vadd.f32 %v784_v14, %v783_v15  ;;  %v266_v60 = vadd.f32 %v260_v34, %v200_v0  ;;  %v780_v56 = vmul.f32 %v1407_v42, %v625_v33 }
 0x164   :  { %v815_v27 = vpop.permute.xlu1 %814  ;;  %v699_v44 = vpop.permute.xlu0 %698  ;;  %v720_v26 = vmul.f32 %v1417_v6, %v625_v33  ;;  %v620_v54 = vmul.f32 %v611_v35, %v1584_v12 }
 0x165   :  { %v443_v61 = vadd.f32 %v437_v28, %v383_v55  ;;  %v326_v10 = vadd.f32 %v320_v52, %v266_v60  ;;  %v837_v53 = vmul.f32 %v815_v27, %v1397_v9  ;;  %v661_v9 = vmul.f32 %v1411_v19, %v625_v33 }
 0x166   :  { %v789_v1 = vsel %vm110_vm0, %v780_v56, 0.0  ;;  %v729_v52 = vsel %vm110_vm0, %v720_v26, 0.0 }
 0x167   :  { %v503_v46 = vadd.f32 %v497_v22, %v443_v61  ;;  %v386_v18 = vadd.f32 %v380_v7, %v326_v10  ;;  %v843_v48 = vsel %vm110_vm0, %v837_v53, 0.0  ;;  %v670_v39 = vsel %vm110_vm0, %v661_v9, 0.0 }
 0x168   :  { %v823_v38 = vpop.permute.xlu1 %822  ;;  %v715_v21 = vpop.permute.xlu0 %714 }
 0x169   :  { %v446_v59 = vadd.f32 %v440_v3, %v386_v18  ;;  %v563_v23 = vadd.f32 %v557_v5, %v503_v46  ;;  %v839_v4 = vmul.f32 %v823_v38, %v1399_v25  ;;  %v722_v50 = vmul.f32 %v715_v21, %v1484_v40 }
 0x16b   :  { %v506_v37 = vadd.f32 %v500_v31, %v446_v59  ;;  %v623_v42 = vadd.f32 %v617_v13, %v563_v23  ;;  %v844_v41 = vsel %vm110_vm0, %v839_v4, 0.0  ;;  %v731_v27 = vsel %vm110_vm0, %v722_v50, 0.0 }
 0x16c   :  { %v845_v25 = vadd.f32 %v844_v41, %v843_v48  ;;  %v827_v0 = vpop.permute.xlu1 %826 }
 0x16d   :  { %v718_v49 = vmul.f32 %v699_v44, %v623_v42  ;;  %v840_v45 = vmul.f32 %v827_v0, %v625_v33  ;;  %v819_v34 = vpop.permute.xlu0 %818  ;;  %v659_v19 = vmul.f32 %v1393_v2, %v623_v42  ;;  %v566_v6 = vadd.f32 %v560_v8, %v506_v37 }
 0x16e   :  { %v838_v43 = vmul.f32 %v819_v34, %v623_v42  ;;  %v778_v15 = vmul.f32 %v1427_v47, %v623_v42 }
 0x16f   :  { %v728_v14 = vsel %vm110_vm0, %v718_v49, 0.0  ;;  %v849_v16 = vsel %vm110_vm0, %v840_v45, 0.0  ;;  %v669_v28 = vsel %vm110_vm0, %v659_v19, 0.0  ;;  %v626_v55 = vadd.f32 %v620_v54, %v566_v6 }
 0x170   :  { %v730_v60 = vadd.f32 %v729_v52, %v728_v14  ;;  %v848_v63 = vsel %vm110_vm0, %v838_v43, 0.0  ;;  %v671_v62 = vadd.f32 %v670_v39, %v669_v28  ;;  %v788_v2 = vsel %vm110_vm0, %v778_v15, 0.0 }
 0x171   :  { %v1503_v44 = vadd.f32 %v849_v16, %v848_v63  ;;  %v656_v11 = vpop.permute.xlu1 %655  ;;  %v662_v47 = vmul.f32 %v1419_v29, %v626_v55  ;;  %v831_v7 = vpop.permute.xlu0 %830  ;;  %v790_v57 = vadd.f32 %v789_v1, %v788_v2 }
 0x172   :  { %v732_v22 = vadd.f32 %v731_v27, %v730_v60  ;;  %v663_v61 = vmul.f32 %v656_v11, %v1484_v40  ;;  %v841_v10 = vmul.f32 %v831_v7, %v626_v55 }
 0x173   :  { %v667_v36 = vsel %vm110_vm0, %v662_v47, 0.0 }
 0x174   :  { %v740_v3 = vsel %vm110_vm0, %v732_v22, 0.0  ;;  %v672_v30 = vsel %vm110_vm0, %v663_v61, 0.0  ;;  %v668_v33 = vadd.f32 %v667_v36, %v1405_v20  ;;  %v846_v24 = vsel %vm110_vm0, %v841_v10, 0.0 }
 0x175   :  { %v741_v5 = vrot.slane %v740_v3, 4  ;;  %v673_v46 = vadd.f32 %v672_v30, %v671_v62  ;;  %v847_v18 = vadd.f32 %v846_v24, %v845_v25 }
 0x176   :  { %v674_v29 = vsel %vm110_vm0, %v668_v33, 0.0  ;;  %v711_v53 = vpop.permute.xlu1 %710 }
 0x177   :  { %v742_v51 = vadd.f32 %v741_v5, %v740_v3  ;;  %v681_v31 = vsel %vm110_vm0, %v673_v46, 0.0  ;;  %v675_v35 = vrot.slane %v674_v29, 4  ;;  %v721_v38 = vmul.f32 %v711_v53, %v626_v55 }
 0x178   :  { %v682_v56 = vrot.slane %v681_v31, 4  ;;  %v853_v42 = vsel %vm110_vm0, %v847_v18, 0.0 }
 0x179   :  { %v676_v21 = vadd.f32 %v675_v35, %v674_v29  ;;  %v726_v13 = vsel %vm110_vm0, %v721_v38, 0.0  ;;  %v743_v59 = vrot.slane %v742_v51, 2  ;;  %v854_v45 = vrot.slane %v853_v42, 4 }
 0x17a   :  { %v683_v17 = vadd.f32 %v682_v56, %v681_v31  ;;  %v727_v20 = vadd.f32 %v726_v13, %v1415_v58 }
 0x17b   :  { %v771_v23 = vpop.permute.xlu1 %770  ;;  %v677_v4 = vrot.slane %v676_v21, 2  ;;  %v744_v54 = vadd.f32 %v743_v59, %v742_v51  ;;  %v855_v60 = vadd.f32 %v854_v45, %v853_v42 }
 0x17c   :  { %v684_v8 = vrot.slane %v683_v17, 2  ;;  %v781_v9 = vmul.f32 %v771_v23, %v626_v55  ;;  %v733_v26 = vsel %vm110_vm0, %v727_v20, 0.0 }
 0x17d   :  { %v678_v37 = vadd.f32 %v677_v4, %v676_v21  ;;  %v734_v41 = vrot.slane %v733_v26, 4  ;;  %v745_v43 = vrot.slane %v744_v54, 1  ;;  %v856_v61 = vrot.slane %v855_v60, 2 }
 0x17e   :  { %v685_v48 = vadd.f32 %v684_v8, %v683_v17  ;;  %v786_v12 = vsel %vm110_vm0, %v781_v9, 0.0 }
 0x17f   :  { %v787_v1 = vadd.f32 %v786_v12, %v1461_v32  ;;  %v775_v25 = vpop.permute.xlu1 %774  ;;  %v679_v50 = vrot.slane %v678_v37, 1  ;;  %v735_v58 = vadd.f32 %v734_v41, %v733_v26  ;;  %v746_v7 = vadd.f32 %v745_v43, %v744_v54 }
 0x180   :  { %v686_v0 = vrot.slane %v685_v48, 1  ;;  %v782_v49 = vmul.f32 %v775_v25, %v1484_v40  ;;  %v857_v24 = vadd.f32 %v856_v61, %v855_v60 }
 0x181   :  { %v793_v34 = vsel %vm110_vm0, %v787_v1, 0.0  ;;  %v680_v19 = vadd.f32 %v679_v50, %v678_v37  ;;  %v736_v39 = vrot.slane %v735_v58, 2 }
 0x182   :  { %v687_v6 = vadd.f32 %v686_v0, %v685_v48  ;;  %v794_v52 = vrot.slane %v793_v34, 4  ;;  %v791_v15 = vsel %vm110_vm0, %v782_v49, 0.0  ;;  %v858_v53 = vrot.slane %v857_v24, 1 }
 0x183   :  { %v737_v14 = vadd.f32 %v736_v39, %v735_v58  ;;  %v792_v28 = vadd.f32 %v791_v15, %v790_v57 }
 0x184   :  { %v795_v16 = vadd.f32 %v794_v52, %v793_v34  ;;  %v835_v32 = vpop.permute.xlu1 %834  ;;  %v690_v55 = vsel %vm137_vm1, %v687_v6, %v680_v19  ;;  %v859_v21 = vadd.f32 %v858_v53, %v857_v24 }
 0x185   :  { %v842_v63 = vmul.f32 %v835_v32, %v1484_v40  ;;  %692 = vst.msk [vmem:[%s1553_s5] sm:$0x3] %vm140_vm2, %v690_v55  ;;  %v738_v62 = vrot.slane %v737_v14, 1  ;;  %v800_v27 = vsel %vm110_vm0, %v792_v28, 0.0 }
 0x186   :  { %v796_v2 = vrot.slane %v795_v16, 2  ;;  %v801_v11 = vrot.slane %v800_v27, 4 }
 0x187   :  { %v851_v47 = vsel %vm110_vm0, %v842_v63, 0.0  ;;  %v739_v57 = vadd.f32 %v738_v62, %v737_v14 }
 0x188   :  { %v852_v22 = vadd.f32 %v851_v47, %v1503_v44  ;;  %v797_v10 = vadd.f32 %v796_v2, %v795_v16  ;;  %v802_v36 = vadd.f32 %v801_v11, %v800_v27 }
 0x189   :  { %v749_v3 = vsel %vm137_vm1, %v746_v7, %v739_v57 }
 0x18a   :  { %v860_v40 = vsel %vm110_vm0, %v852_v22, 0.0  ;;  %v803_v30 = vrot.slane %v802_v36, 2  ;;  %894 = vst.msk [vmem:[%s1553_s5 + $0x2] sm:$0x3] %vm140_vm2, %v749_v3  ;;  %v798_v5 = vrot.slane %v797_v10, 1 }
 0x18b   :  { %v861_v33 = vrot.slane %v860_v40, 4 }
 0x18c   :  { %v804_v46 = vadd.f32 %v803_v30, %v802_v36  ;;  %v799_v51 = vadd.f32 %v798_v5, %v797_v10 }
 0x18d   :  { %v862_v18 = vadd.f32 %v861_v33, %v860_v40 }
 0x18e   :  { %v805_v29 = vrot.slane %v804_v46, 1 }
 0x18f   :  { %v863_v44 = vrot.slane %v862_v18, 2 }
 0x190   :  { %v806_v31 = vadd.f32 %v805_v29, %v804_v46 }
 0x191   :  { %v864_v35 = vadd.f32 %v863_v44, %v862_v18 }
 0x192   :  { %v809_v38 = vsel %vm137_vm1, %v806_v31, %v799_v51 }
 0x193   :  { %v865_v56 = vrot.slane %v864_v35, 1  ;;  %895 = vst.msk [vmem:[%s1553_s5 + $0x4] sm:$0x3] %vm140_vm2, %v809_v38 }
 0x195   :  { %v866_v17 = vadd.f32 %v865_v56, %v864_v35 }
 0x197   :  { %v869_v13 = vsel %vm137_vm1, %v866_v17, %v859_v21 }
 0x198   :  { %896 = vst.msk [vmem:[%s1553_s5 + $0x6] sm:$0x3] %vm140_vm2, %v869_v13 }
 0x199   :  { %955 = dma.done.wait [#allocation3], 32  }
 0x19a   :  { %956 = vsyncadd [#allocation3], 4294967264 }
 0x19b   :  { %890 = vsyncpa [#allocation3], 1 }

</bundles_post_ra>
